<compile_context>
chip_gen: v6e
topology: v6e:2x2x1
jax: 0.10.0
libtpu: 0.0.40
codegen_flags: <defaults>
</compile_context>

<pallas_src>
import functools
import math

import jax
import jax.numpy as jnp
from jax.experimental import pallas as pl
from jax.experimental.pallas import tpu as pltpu

_LANE = 128      # lane (last-dim) granularity
_SUBLANE = 8     # sublane (second-to-last dim) granularity
_MAX_BLOCK_B = 256  # batch tile cap (matches v6e/v7x MXU geometry)


def _round_up(n, m):
    return ((n + m - 1) // m) * m


def _mlp_kernel(*refs, num_layers):
    """refs = (x_ref, w0, b0, w1, b1, ..., w_{L-1}, b_{L-1}, o_ref).

    y = tanh( fcL-1( sigmoid( ... fc1( sigmoid( fc0(x) ) ) ... ) ) )
    Entire layer stack unrolled inside one kernel body; the activation stays
    resident in VMEM/vregs between layers.
    """
    x_ref = refs[0]
    o_ref = refs[-1]
    wb = refs[1:-1]

    y = jnp.dot(x_ref[...], wb[0][...], preferred_element_type=jnp.float32)
    y = y + wb[1][...].astype(jnp.float32)
    for i in range(1, num_layers):
        y = jax.nn.sigmoid(y)
        y = jnp.dot(y, wb[2 * i][...], preferred_element_type=jnp.float32)
        y = y + wb[2 * i + 1][...].astype(jnp.float32)
    o_ref[...] = jnp.tanh(y).astype(o_ref.dtype)


def _fused_mlp(x_pad, weights_pad, *, num_layers, block_b):
    """x_pad: (B_pad, K_pad) f32.  weights_pad: list of (W_t (in_p,out_p), b (1,out_p))."""
    b_pad, k_pad = x_pad.shape
    h_pad = weights_pad[0][0].shape[1]
    grid = (b_pad // block_b,)

    in_specs = [pl.BlockSpec((block_b, k_pad), lambda i: (i, 0))]
    flat_params = []
    for (w, b) in weights_pad:
        in_dim, out_dim = w.shape
        in_specs.append(pl.BlockSpec((in_dim, out_dim), lambda i: (0, 0)))
        in_specs.append(pl.BlockSpec((1, out_dim), lambda i: (0, 0)))
        flat_params += [w, b]

    kernel = functools.partial(_mlp_kernel, num_layers=num_layers)

    # Advisory cost estimate (per review): flops of all matmuls, transcendental
    # count for the sigmoid/tanh, bytes for every operand + output.
    flops = 2 * b_pad * k_pad * h_pad + 2 * b_pad * h_pad * h_pad * (num_layers - 1)
    transcendentals = b_pad * h_pad * num_layers
    bytes_accessed = 4 * (x_pad.size + b_pad * h_pad) + sum(
        w.size * w.dtype.itemsize + b.size * b.dtype.itemsize for w, b in weights_pad
    )

    return pl.pallas_call(
        kernel,
        out_shape=jax.ShapeDtypeStruct((b_pad, h_pad), jnp.float32),
        grid=grid,
        in_specs=in_specs,
        out_specs=pl.BlockSpec((block_b, h_pad), lambda i: (i, 0)),
        compiler_params=pltpu.CompilerParams(
            dimension_semantics=("parallel",),   # v7x: split batch tiles over 2 TCs
        ),
        cost_estimate=pl.CostEstimate(
            flops=flops,
            transcendentals=transcendentals,
            bytes_accessed=bytes_accessed,
        ),
    )(x_pad, *flat_params)


class ForwardControllerPallas:
    """Deterministically initialized JAX/Pallas port of ForwardController."""

    def __init__(self, input_dim, hidden_dim, num_layers=1, key=None,
                 param_dtype=jnp.float32):
        if key is None:
            key = jax.random.PRNGKey(0)
        self.input_dim = input_dim
        self.hidden_dim = hidden_dim
        self.num_layers = num_layers
        self.param_dtype = param_dtype

        self.k_pad = _round_up(input_dim, _LANE)
        self.h_pad = _round_up(hidden_dim, _LANE)

        self.weights = []       # unpadded (W_t (in, out), b (out,)) for the reference
        self.weights_pad = []   # zero-padded (W_t (in_pad, out_pad), b (1, out_pad))
        in_dim, in_pad = input_dim, self.k_pad
        for _ in range(num_layers):
            key, kw, kb = jax.random.split(key, 3)
            bound = 1.0 / math.sqrt(in_dim)     # nn.Linear default init range
            w = jax.random.uniform(kw, (hidden_dim, in_dim), jnp.float32, -bound, bound)
            b = jax.random.uniform(kb, (hidden_dim,), jnp.float32, -bound, bound)
            w_t = w.T                            # (in, out): lane-dense matmul
            self.weights.append((w_t, b))

            # Padding MUST be zeros so padded lanes stay mathematically inert
            # (sigmoid(0)=0.5 in padded lanes multiplies zero weight rows).
            w_t_pad = jnp.zeros((in_pad, self.h_pad), jnp.float32)
            w_t_pad = w_t_pad.at[:in_dim, :hidden_dim].set(w_t)
            b_pad = jnp.zeros((1, self.h_pad), jnp.float32)
            b_pad = b_pad.at[0, :hidden_dim].set(b)
            self.weights_pad.append(
                (w_t_pad.astype(param_dtype), b_pad.astype(param_dtype))
            )
            in_dim, in_pad = hidden_dim, self.h_pad

    def __call__(self, inputs):
        batch, in_dim = inputs.shape
        assert in_dim == self.input_dim

        # Batch tiling: pad to sublane granularity; cap tile at 256 rows and
        # iterate a (parallel) grid over tiles for larger batches.
        b_pad = _round_up(batch, _SUBLANE)
        block_b = b_pad if b_pad <= _MAX_BLOCK_B else _MAX_BLOCK_B
        b_pad = _round_up(batch, block_b)

        x_pad = jnp.zeros((b_pad, self.k_pad), jnp.float32)
        x_pad = x_pad.at[:batch, :in_dim].set(inputs.astype(jnp.float32))

        out_pad = _fused_mlp(
            x_pad, self.weights_pad, num_layers=self.num_layers, block_b=block_b
        )
        return out_pad[:batch, :self.hidden_dim]

    def reference(self, inputs):
        """Pure-JAX reference matching the PyTorch forward exactly."""
        x = inputs @ self.weights[0][0] + self.weights[0][1]
        for i in range(1, self.num_layers):
            x = jax.nn.sigmoid(x)
            x = x @ self.weights[i][0] + self.weights[i][1]
        return jnp.tanh(x)


if __name__ == "__main__":
    batch, input_dim, hidden_dim, num_layers = 8, 16, 32, 3

    key = jax.random.PRNGKey(0)
    key_in, key_params = jax.random.split(key)
    x = jax.random.normal(key_in, (batch, input_dim), dtype=jnp.float32)

    ctrl = ForwardControllerPallas(input_dim, hidden_dim, num_layers, key_params)

    out = jax.block_until_ready(ctrl(x))
    ref = jax.block_until_ready(ctrl.reference(x))

    assert out.shape == (batch, hidden_dim)
    assert jnp.allclose(out, ref, atol=1e-5, rtol=1e-5), "mismatch vs reference"

    print("KERNEL_OK")
</pallas_src>

<mosaic_0001>
module attributes {stable_mosaic.version = 11 : i64} {
  func.func @_mlp_kernel(%arg0: i32, %arg1: memref<8x128xf32, #tpu.memory_space<vmem>>, %arg2: memref<128x128xf32, #tpu.memory_space<vmem>>, %arg3: memref<1x128xf32, #tpu.memory_space<vmem>>, %arg4: memref<128x128xf32, #tpu.memory_space<vmem>>, %arg5: memref<1x128xf32, #tpu.memory_space<vmem>>, %arg6: memref<128x128xf32, #tpu.memory_space<vmem>>, %arg7: memref<1x128xf32, #tpu.memory_space<vmem>>, %arg8: memref<8x128xf32, #tpu.memory_space<vmem>>) attributes {dimension_semantics = [#tpu.dimension_semantics<parallel>], iteration_bounds = array<i64: 1>, scalar_prefetch = 0 : i64, scratch_operands = 0 : i64, tpu.core_type = #tpu.core_type<tc>, window_params = [{transform_indices = @transform_0, window_bounds = array<i64: 8, 128>}, {pipeline_mode = #tpu.pipeline_mode<synchronous>, transform_indices = @transform_1, window_bounds = array<i64: 128, 128>}, {pipeline_mode = #tpu.pipeline_mode<synchronous>, transform_indices = @transform_2, window_bounds = array<i64: 1, 128>}, {pipeline_mode = #tpu.pipeline_mode<synchronous>, transform_indices = @transform_3, window_bounds = array<i64: 128, 128>}, {pipeline_mode = #tpu.pipeline_mode<synchronous>, transform_indices = @transform_4, window_bounds = array<i64: 1, 128>}, {pipeline_mode = #tpu.pipeline_mode<synchronous>, transform_indices = @transform_5, window_bounds = array<i64: 128, 128>}, {pipeline_mode = #tpu.pipeline_mode<synchronous>, transform_indices = @transform_6, window_bounds = array<i64: 1, 128>}, {transform_indices = @transform_7, window_bounds = array<i64: 8, 128>}]} {
    %c0 = arith.constant 0 : index
    %c0_0 = arith.constant 0 : index
    %0 = vector.load %arg1[%c0, %c0_0] : memref<8x128xf32, #tpu.memory_space<vmem>>, vector<8x128xf32>
    %c0_1 = arith.constant 0 : index
    %c0_2 = arith.constant 0 : index
    %1 = vector.load %arg2[%c0_1, %c0_2] : memref<128x128xf32, #tpu.memory_space<vmem>>, vector<128x128xf32>
    %cst = arith.constant dense<0.000000e+00> : vector<8x128xf32>
    %2 = tpu.matmul %0, %1, %cst {dimension_numbers = #tpu.dot_dimension_numbers<[1], [0], [0], [1], [0, 0, 1, 1], [], []>} : vector<8x128xf32>, vector<128x128xf32>, vector<8x128xf32> -> vector<8x128xf32>
    %c0_3 = arith.constant 0 : index
    %c0_4 = arith.constant 0 : index
    %3 = vector.load %arg3[%c0_3, %c0_4] : memref<1x128xf32, #tpu.memory_space<vmem>>, vector<1x128xf32>
    %4 = vector.broadcast %3 : vector<1x128xf32> to vector<8x128xf32>
    %5 = arith.addf %2, %4 : vector<8x128xf32>
    %6 = arith.negf %5 : vector<8x128xf32>
    %7 = math.exp %6 : vector<8x128xf32>
    %cst_5 = arith.constant 1.000000e+00 : f32
    %8 = vector.broadcast %cst_5 : f32 to vector<8x128xf32>
    %9 = arith.addf %8, %7 : vector<8x128xf32>
    %10 = arith.divf %8, %9 : vector<8x128xf32>
    %c0_6 = arith.constant 0 : index
    %c0_7 = arith.constant 0 : index
    %11 = vector.load %arg4[%c0_6, %c0_7] : memref<128x128xf32, #tpu.memory_space<vmem>>, vector<128x128xf32>
    %cst_8 = arith.constant dense<0.000000e+00> : vector<8x128xf32>
    %12 = tpu.matmul %10, %11, %cst_8 {dimension_numbers = #tpu.dot_dimension_numbers<[1], [0], [0], [1], [0, 0, 1, 1], [], []>} : vector<8x128xf32>, vector<128x128xf32>, vector<8x128xf32> -> vector<8x128xf32>
    %c0_9 = arith.constant 0 : index
    %c0_10 = arith.constant 0 : index
    %13 = vector.load %arg5[%c0_9, %c0_10] : memref<1x128xf32, #tpu.memory_space<vmem>>, vector<1x128xf32>
    %14 = vector.broadcast %13 : vector<1x128xf32> to vector<8x128xf32>
    %15 = arith.addf %12, %14 : vector<8x128xf32>
    %16 = arith.negf %15 : vector<8x128xf32>
    %17 = math.exp %16 : vector<8x128xf32>
    %cst_11 = arith.constant 1.000000e+00 : f32
    %18 = vector.broadcast %cst_11 : f32 to vector<8x128xf32>
    %19 = arith.addf %18, %17 : vector<8x128xf32>
    %20 = arith.divf %18, %19 : vector<8x128xf32>
    %c0_12 = arith.constant 0 : index
    %c0_13 = arith.constant 0 : index
    %21 = vector.load %arg6[%c0_12, %c0_13] : memref<128x128xf32, #tpu.memory_space<vmem>>, vector<128x128xf32>
    %cst_14 = arith.constant dense<0.000000e+00> : vector<8x128xf32>
    %22 = tpu.matmul %20, %21, %cst_14 {dimension_numbers = #tpu.dot_dimension_numbers<[1], [0], [0], [1], [0, 0, 1, 1], [], []>} : vector<8x128xf32>, vector<128x128xf32>, vector<8x128xf32> -> vector<8x128xf32>
    %c0_15 = arith.constant 0 : index
    %c0_16 = arith.constant 0 : index
    %23 = vector.load %arg7[%c0_15, %c0_16] : memref<1x128xf32, #tpu.memory_space<vmem>>, vector<1x128xf32>
    %24 = vector.broadcast %23 : vector<1x128xf32> to vector<8x128xf32>
    %25 = arith.addf %22, %24 : vector<8x128xf32>
    %26 = math.tanh %25 : vector<8x128xf32>
    %c0_17 = arith.constant 0 : index
    %c0_18 = arith.constant 0 : index
    %27 = vector.load %arg8[%c0_17, %c0_18] : memref<8x128xf32, #tpu.memory_space<vmem>>, vector<8x128xf32>
    tpu.vector_store %arg8[%c0_17, %c0_18], %26 {strides = array<i32>} : memref<8x128xf32, #tpu.memory_space<vmem>>, vector<8x128xf32>,
    return
  }
  func.func @transform_0(%arg0: i32) -> (i32, i32) {
    %c0_i32 = arith.constant 0 : i32
    %c0_i32_0 = arith.constant 0 : i32
    return %arg0, %c0_i32 : i32, i32
  }
  func.func @transform_1(%arg0: i32) -> (i32, i32) {
    %c0_i32 = arith.constant 0 : i32
    %c0_i32_0 = arith.constant 0 : i32
    %c0_i32_1 = arith.constant 0 : i32
    return %c0_i32, %c0_i32_0 : i32, i32
  }
  func.func @transform_2(%arg0: i32) -> (i32, i32) {
    %c0_i32 = arith.constant 0 : i32
    %c0_i32_0 = arith.constant 0 : i32
    %c0_i32_1 = arith.constant 0 : i32
    return %c0_i32, %c0_i32_0 : i32, i32
  }
  func.func @transform_3(%arg0: i32) -> (i32, i32) {
    %c0_i32 = arith.constant 0 : i32
    %c0_i32_0 = arith.constant 0 : i32
    %c0_i32_1 = arith.constant 0 : i32
    return %c0_i32, %c0_i32_0 : i32, i32
  }
  func.func @transform_4(%arg0: i32) -> (i32, i32) {
    %c0_i32 = arith.constant 0 : i32
    %c0_i32_0 = arith.constant 0 : i32
    %c0_i32_1 = arith.constant 0 : i32
    return %c0_i32, %c0_i32_0 : i32, i32
  }
  func.func @transform_5(%arg0: i32) -> (i32, i32) {
    %c0_i32 = arith.constant 0 : i32
    %c0_i32_0 = arith.constant 0 : i32
    %c0_i32_1 = arith.constant 0 : i32
    return %c0_i32, %c0_i32_0 : i32, i32
  }
  func.func @transform_6(%arg0: i32) -> (i32, i32) {
    %c0_i32 = arith.constant 0 : i32
    %c0_i32_0 = arith.constant 0 : i32
    %c0_i32_1 = arith.constant 0 : i32
    return %c0_i32, %c0_i32_0 : i32, i32
  }
  func.func @transform_7(%arg0: i32) -> (i32, i32) {
    %c0_i32 = arith.constant 0 : i32
    %c0_i32_0 = arith.constant 0 : i32
    return %arg0, %c0_i32 : i32, i32
  }
}

</mosaic_0001>

<bundles_post_ra>
// kernel: tpu_custom_call.1
= control target key start
LH: loop header
LB: loop body
LE: loop exit
PB: predicated region body
PF: predicated region fallthrough
CT: control target
= control target key end

     0   :  { %12 = vsyncpa [#allocation3], 0  ;;  %s815_s0 = inlined_call_operand.hbm [shape: f32[8,128], index: 0, kind: input, shape index: {}]   ;;  %s816_s1 = inlined_call_operand.hbm [shape: f32[128,128], index: 1, kind: input, shape index: {}]   ;;  %s817_s2 = inlined_call_operand.vmem [shape: f32[1,128], index: 2, kind: input, shape index: {}]   ;;  %s818_s3 = inlined_call_operand.hbm [shape: f32[128,128], index: 3, kind: input, shape index: {}]   ;;  %s819_s4 = inlined_call_operand.vmem [shape: f32[1,128], index: 4, kind: input, shape index: {}]   ;;  %s820_s5 = inlined_call_operand.hbm [shape: f32[128,128], index: 5, kind: input, shape index: {}]   ;;  %s821_s6 = inlined_call_operand.vmem [shape: f32[1,128], index: 6, kind: input, shape index: {}]   ;;  %s822_s7 = inlined_call_operand.hbm [shape: f32[8,128], index: 7, kind: output, shape index: {}]  }
   0x1   :  { %13 = vsyncpa [#allocation6], 0 }
   0x2   :  { %14 = vsyncpa [#allocation9], 0 }
   0x3   :  { %15 = vsyncpa [#allocation4], 0  ;;  %s679_s24 = smov [#allocation5]  }
   0x4   :  { %s31_s25 = sshll.u32 %s679_s24, 4  ;;  %s32_s25 = int_to_ptr.vmem [resolvable:$true] %s31_s25 }
   0x5   :  { %s579_s26 = scalar_lea.vmem %s32_s25, 2048  ;;  %p584_p1 = scmp.lt.s32.totalorder %s32_s25, %s32_s25 }
   0x6   :  { %p580_p0 = scmp.ne.s32.totalorder %s32_s25, %s579_s26  ;;  %p585_p2 = scmp.lt.s32.totalorder %s579_s26, %s579_s26 }
   0x8   :  { %p586_p3 = por %p585_p2, %p584_p1 }
   0xa   :  { %p587_p4 = pnand %p586_p3, %p580_p0 }
   0xc   :  { %590 = shalt.err (!%p587_p4)
}
   0xd   :  { %s680_s27 = smov 128   ;;  %s681_s28 = smov 8  }
   0xe   :  { %37 = dma.hbm_to_vmem [thread:$0]  %s816_s1, 2048, %s32_s25, [#allocation6], %s680_s27, %s680_s27, %s681_s28  }
   0xf   :  { %s682_s8 = smov [#allocation2]   ;;  %s683_s10 = smov [#allocation7]  }
  0x10   :  { %s22_s9 = sshll.u32 %s682_s8, 4  ;;  %s45_s11 = sshll.u32 %s683_s10, 4  ;;  %s23_s9 = int_to_ptr.vmem [resolvable:$true] %s22_s9  ;;  %s46_s11 = int_to_ptr.vmem [resolvable:$true] %s45_s11 }
  0x11   :  { %s599_s12 = scalar_lea.vmem %s23_s9, 128  ;;  %p604_p6 = scmp.lt.s32.totalorder %s23_s9, %s23_s9 }
  0x12   :  { %p600_p5 = scmp.ne.s32.totalorder %s23_s9, %s599_s12  ;;  %p605_p7 = scmp.lt.s32.totalorder %s599_s12, %s599_s12 }
  0x14   :  { %p606_p8 = por %p605_p7, %p604_p6 }
  0x16   :  { %p607_p9 = pnand %p606_p8, %p600_p5 }
  0x18   :  { %610 = shalt.err (!%p607_p9)
}
  0x19   :  { %25 = dma.hbm_to_vmem [thread:$0]  %s815_s0, 128, %s23_s9, [#allocation3]  }
  0x1a   :  { %s619_s15 = scalar_lea.vmem %s46_s11, 2048  ;;  %p624_p11 = scmp.lt.s32.totalorder %s46_s11, %s46_s11 }
  0x1b   :  { %p620_p10 = scmp.ne.s32.totalorder %s46_s11, %s619_s15  ;;  %p625_p12 = scmp.lt.s32.totalorder %s619_s15, %s619_s15 }
  0x1d   :  { %p626_p13 = por %p625_p12, %p624_p11 }
  0x1f   :  { %p627_p0 = pnand %p626_p13, %p620_p10 }
  0x21   :  { %630 = shalt.err (!%p627_p0)
}
  0x22   :  { %51 = dma.hbm_to_vmem [thread:$0]  %s818_s3, 2048, %s46_s11, [#allocation6], %s680_s27, %s680_s27, %s681_s28  }
  0x23   :  { %s684_s17 = smov [#allocation8]  }
  0x24   :  { %s59_s18 = sshll.u32 %s684_s17, 4  ;;  %s60_s18 = int_to_ptr.vmem [resolvable:$true] %s59_s18 }
  0x25   :  { %s639_s19 = scalar_lea.vmem %s60_s18, 2048  ;;  %p644_p2 = scmp.lt.s32.totalorder %s60_s18, %s60_s18 }
  0x26   :  { %p640_p1 = scmp.ne.s32.totalorder %s60_s18, %s639_s19  ;;  %p645_p3 = scmp.lt.s32.totalorder %s639_s19, %s639_s19 }
  0x28   :  { %p646_p4 = por %p645_p3, %p644_p2 }
  0x2a   :  { %p647_p5 = pnand %p646_p4, %p640_p1 }
  0x2c   :  { %650 = shalt.err (!%p647_p5)
}
  0x2d   :  { %65 = dma.hbm_to_vmem [thread:$0]  %s820_s5, 2048, %s60_s18, [#allocation9], %s680_s27, %s680_s27, %s681_s28  }
  0x2e   :  { %671 = dma.done.wait [#allocation3], 128  }
  0x2f   :  { %672 = vsyncadd [#allocation3], 4294967168 }
  0x30   :  { %673 = dma.done.wait [#allocation6], 4096  }
  0x31   :  { %674 = vsyncadd [#allocation6], 4294963200 }
  0x32   :  { %675 = dma.done.wait [#allocation9], 2048  }
  0x33   :  { %676 = vsyncadd [#allocation9], 4294965248  ;;  %v685_v0 = vmov 0.0   ;;  %vm686_vm0 = vmmov 0   ;;  %v96_v1 = vld [vmem:[#allocation5 + $0x78] sm:$0xff]  ;;  %v95_v2 = vld [vmem:[#allocation5 + $0x70] sm:$0xff] }
  0x34   :  { %447 = vmatprep.subr.mxu0 %v685_v0  ;;  %479 = vmatprep.mubr.msk.f32.mxu0 %vm686_vm0, %v685_v0  ;;  %v94_v3 = vld [vmem:[#allocation5 + $0x68] sm:$0xff]  ;;  %v93_v4 = vld [vmem:[#allocation5 + $0x60] sm:$0xff]  ;;  %v92_v5 = vld [vmem:[#allocation5 + $0x58] sm:$0xff]  ;;  %s687_s24 = smov [#allocation10]  }
  0x35   :  { %482 = vmatprep.subr.mxu1 %v685_v0  ;;  %514 = vmatprep.mubr.msk.f32.mxu1 %vm686_vm0, %v685_v0  ;;  %v91_v6 = vld [vmem:[#allocation5 + $0x50] sm:$0xff]  ;;  %v90_v7 = vld [vmem:[#allocation5 + $0x48] sm:$0xff]  ;;  %v89_v8 = vld [vmem:[#allocation5 + $0x40] sm:$0xff] }
  0x36   :  { %448 = vmatpush3.msra.mxu0 %v96_v1  ;;  %v88_v9 = vld [vmem:[#allocation5 + $0x38] sm:$0xff]  ;;  %v87_v10 = vld [vmem:[#allocation5 + $0x30] sm:$0xff]  ;;  %v86_v11 = vld [vmem:[#allocation5 + $0x28] sm:$0xff] }
  0x37   :  { %449 = vmatprep.subr.mxu0 %v685_v0  ;;  %v85_v12 = vld [vmem:[#allocation5 + $0x20] sm:$0xff]  ;;  %v84_v13 = vld [vmem:[#allocation5 + $0x18] sm:$0xff]  ;;  %v83_v14 = vld [vmem:[#allocation5 + $0x10] sm:$0xff] }
  0x38   :  { %450 = vmatpush3.msra.mxu0 %v95_v2  ;;  %v82_v15 = vld [vmem:[#allocation5 + $0x8] sm:$0xff]  ;;  %v81_v16 = vld [vmem:[#allocation5] sm:$0xff]  ;;  %v80_v17 = vld [vmem:[#allocation2] sm:$0xff] }
  0x39   :  { %451 = vmatprep.subr.mxu0 %v685_v0  ;;  %v195_v18 = vld [vmem:[#allocation7 + $0x78] sm:$0xff]  ;;  %v194_v19 = vld [vmem:[#allocation7 + $0x70] sm:$0xff]  ;;  %v193_v20 = vld [vmem:[#allocation7 + $0x68] sm:$0xff] }
  0x3a   :  { %452 = vmatpush3.msra.mxu0 %v94_v3  ;;  %483 = vmatpush3.msra.mxu1 %v195_v18  ;;  %v192_v21 = vld [vmem:[#allocation7 + $0x60] sm:$0xff]  ;;  %v191_v22 = vld [vmem:[#allocation7 + $0x58] sm:$0xff]  ;;  %v190_v23 = vld [vmem:[#allocation7 + $0x50] sm:$0xff] }
  0x3b   :  { %453 = vmatprep.subr.mxu0 %v685_v0  ;;  %484 = vmatprep.subr.mxu1 %v685_v0  ;;  %v189_v24 = vld [vmem:[#allocation7 + $0x48] sm:$0xff]  ;;  %v188_v25 = vld [vmem:[#allocation7 + $0x40] sm:$0xff]  ;;  %v187_v26 = vld [vmem:[#allocation7 + $0x38] sm:$0xff] }
  0x3c   :  { %454 = vmatpush3.msra.mxu0 %v93_v4  ;;  %485 = vmatpush3.msra.mxu1 %v194_v19  ;;  %v186_v27 = vld [vmem:[#allocation7 + $0x30] sm:$0xff]  ;;  %v185_v28 = vld [vmem:[#allocation7 + $0x28] sm:$0xff]  ;;  %v184_v29 = vld [vmem:[#allocation7 + $0x20] sm:$0xff] }
  0x3d   :  { %455 = vmatprep.subr.mxu0 %v685_v0  ;;  %486 = vmatprep.subr.mxu1 %v685_v0  ;;  %v183_v30 = vld [vmem:[#allocation7 + $0x18] sm:$0xff]  ;;  %v182_v31 = vld [vmem:[#allocation7 + $0x10] sm:$0xff]  ;;  %v181_v32 = vld [vmem:[#allocation7 + $0x8] sm:$0xff] }
  0x3e   :  { %456 = vmatpush3.msra.mxu0 %v92_v5  ;;  %487 = vmatpush3.msra.mxu1 %v193_v20  ;;  %v180_v33 = vld [vmem:[#allocation7] sm:$0xff]  ;;  %v391_v34 = vld [vmem:[%s817_s2] ss:$0 sm:$0xff]  ;;  %v293_v43 = vld [vmem:[#allocation8 + $0x70] sm:$0xff] }
  0x3f   :  { %457 = vmatprep.subr.mxu0 %v685_v0  ;;  %488 = vmatprep.subr.mxu1 %v685_v0  ;;  %v294_v42 = vld [vmem:[#allocation8 + $0x78] sm:$0xff]  ;;  %v292_v44 = vld [vmem:[#allocation8 + $0x68] sm:$0xff]  ;;  %v291_v45 = vld [vmem:[#allocation8 + $0x60] sm:$0xff] }
  0x40   :  { %458 = vmatpush3.msra.mxu0 %v91_v6  ;;  %489 = vmatpush3.msra.mxu1 %v192_v21  ;;  %v290_v46 = vld [vmem:[#allocation8 + $0x58] sm:$0xff]  ;;  %v289_v47 = vld [vmem:[#allocation8 + $0x50] sm:$0xff]  ;;  %v288_v48 = vld [vmem:[#allocation8 + $0x48] sm:$0xff] }
  0x41   :  { %459 = vmatprep.subr.mxu0 %v685_v0  ;;  %490 = vmatprep.subr.mxu1 %v685_v0  ;;  %v287_v49 = vld [vmem:[#allocation8 + $0x40] sm:$0xff]  ;;  %v286_v50 = vld [vmem:[#allocation8 + $0x38] sm:$0xff]  ;;  %v285_v51 = vld [vmem:[#allocation8 + $0x30] sm:$0xff] }
  0x42   :  { %460 = vmatpush3.msra.mxu0 %v90_v7  ;;  %491 = vmatpush3.msra.mxu1 %v191_v22  ;;  %v284_v52 = vld [vmem:[#allocation8 + $0x28] sm:$0xff]  ;;  %v283_v53 = vld [vmem:[#allocation8 + $0x20] sm:$0xff]  ;;  %v282_v54 = vld [vmem:[#allocation8 + $0x18] sm:$0xff] }
  0x43   :  { %461 = vmatprep.subr.mxu0 %v685_v0  ;;  %492 = vmatprep.subr.mxu1 %v685_v0  ;;  %v281_v55 = vld [vmem:[#allocation8 + $0x10] sm:$0xff]  ;;  %v280_v56 = vld [vmem:[#allocation8 + $0x8] sm:$0xff]  ;;  %v279_v57 = vld [vmem:[#allocation8] sm:$0xff] }
  0x44   :  { %462 = vmatpush3.msra.mxu0 %v89_v8  ;;  %493 = vmatpush3.msra.mxu1 %v190_v23  ;;  %v393_v58 = vld [vmem:[%s819_s4] ss:$0 sm:$0xff]  ;;  %s380_s4 = sshll.u32 %s687_s24, 4  ;;  %s381_s4 = int_to_ptr.vmem [resolvable:$true] %s380_s4 }
  0x45   :  { %463 = vmatprep.subr.mxu0 %v685_v0  ;;  %494 = vmatprep.subr.mxu1 %v685_v0  ;;  %v395_v3 = vld [vmem:[%s821_s6] ss:$0 sm:$0xff]  ;;  %s651_s25 = scalar_lea.vmem %s381_s4, 128  ;;  %p656_p7 = scmp.lt.s32.totalorder %s381_s4, %s381_s4 }
  0x46   :  { %464 = vmatpush3.msra.mxu0 %v88_v9  ;;  %495 = vmatpush3.msra.mxu1 %v189_v24  ;;  %p652_p6 = scmp.ne.s32.totalorder %s381_s4, %s651_s25  ;;  %p657_p8 = scmp.lt.s32.totalorder %s651_s25, %s651_s25 }
  0x47   :  { %465 = vmatprep.subr.mxu0 %v685_v0  ;;  %496 = vmatprep.subr.mxu1 %v685_v0 }
  0x48   :  { %466 = vmatpush3.msra.mxu0 %v87_v10  ;;  %497 = vmatpush3.msra.mxu1 %v188_v25  ;;  %p658_p9 = por %p657_p8, %p656_p7 }
  0x49   :  { %467 = vmatprep.subr.mxu0 %v685_v0  ;;  %498 = vmatprep.subr.mxu1 %v685_v0 }
  0x4a   :  { %468 = vmatpush3.msra.mxu0 %v86_v11  ;;  %499 = vmatpush3.msra.mxu1 %v187_v26  ;;  %p659_p10 = pnand %p658_p9, %p652_p6 }
  0x4b   :  { %469 = vmatprep.subr.mxu0 %v685_v0  ;;  %500 = vmatprep.subr.mxu1 %v685_v0 }
  0x4c   :  { %470 = vmatpush3.msra.mxu0 %v85_v12  ;;  %501 = vmatpush3.msra.mxu1 %v186_v27 }
  0x4d   :  { %471 = vmatprep.subr.mxu0 %v685_v0  ;;  %502 = vmatprep.subr.mxu1 %v685_v0 }
  0x4e   :  { %472 = vmatpush3.msra.mxu0 %v84_v13  ;;  %503 = vmatpush3.msra.mxu1 %v185_v28 }
  0x4f   :  { %473 = vmatprep.subr.mxu0 %v685_v0  ;;  %504 = vmatprep.subr.mxu1 %v685_v0 }
  0x50   :  { %474 = vmatpush3.msra.mxu0 %v83_v14  ;;  %505 = vmatpush3.msra.mxu1 %v184_v29 }
  0x51   :  { %475 = vmatprep.subr.mxu0 %v685_v0  ;;  %506 = vmatprep.subr.mxu1 %v685_v0 }
  0x52   :  { %476 = vmatpush3.msra.mxu0 %v82_v15  ;;  %507 = vmatpush3.msra.mxu1 %v183_v30 }
  0x53   :  { %477 = vmatprep.subr.mxu0 %v685_v0  ;;  %508 = vmatprep.subr.mxu1 %v685_v0 }
  0x54   :  { %478 = vmatpush3.msra.mxu0 %v81_v16  ;;  %509 = vmatpush3.msra.mxu1 %v182_v31 }
  0x55   :  { %480 = vmatmul.mubr.f32.vlgmr.msra.gmra.mxu0 %v80_v17  ;;  %517 = vmatprep.subr.mxu0 %v685_v0 }
  0x56   :  { %549 = vmatprep.mubr.msk.f32.mxu0 %vm686_vm0, %v685_v0  ;;  %510 = vmatprep.subr.mxu1 %v685_v0 }
  0x57   :  { %511 = vmatpush3.msra.mxu1 %v181_v32  ;;  %518 = vmatpush3.msra.mxu0 %v294_v42 }
  0x58   :  { %512 = vmatprep.subr.mxu1 %v685_v0  ;;  %519 = vmatprep.subr.mxu0 %v685_v0 }
  0x59   :  { %513 = vmatpush3.msra.mxu1 %v180_v33  ;;  %520 = vmatpush3.msra.mxu0 %v293_v43 }
  0x5a   :  { %521 = vmatprep.subr.mxu0 %v685_v0 }
  0x5b   :  { %522 = vmatpush3.msra.mxu0 %v292_v44 }
  0x5c   :  { %523 = vmatprep.subr.mxu0 %v685_v0 }
  0x5d   :  { %524 = vmatpush3.msra.mxu0 %v291_v45 }
  0x5e   :  { %525 = vmatprep.subr.mxu0 %v685_v0 }
  0x5f   :  { %526 = vmatpush3.msra.mxu0 %v290_v46 }
  0x60   :  { %527 = vmatprep.subr.mxu0 %v685_v0 }
  0x61   :  { %528 = vmatpush3.msra.mxu0 %v289_v47 }
  0x62   :  { %529 = vmatprep.subr.mxu0 %v685_v0 }
  0x63   :  { %530 = vmatpush3.msra.mxu0 %v288_v48 }
  0x64   :  { %531 = vmatprep.subr.mxu0 %v685_v0 }
  0x65   :  { %532 = vmatpush3.msra.mxu0 %v287_v49 }
  0x66   :  { %533 = vmatprep.subr.mxu0 %v685_v0 }
  0x67   :  { %534 = vmatpush3.msra.mxu0 %v286_v50 }
  0x68   :  { %535 = vmatprep.subr.mxu0 %v685_v0 }
  0x69   :  { %536 = vmatpush3.msra.mxu0 %v285_v51 }
  0x6a   :  { %537 = vmatprep.subr.mxu0 %v685_v0 }
  0x6b   :  { %538 = vmatpush3.msra.mxu0 %v284_v52 }
  0x6c   :  { %539 = vmatprep.subr.mxu0 %v685_v0 }
  0x6d   :  { %540 = vmatpush3.msra.mxu0 %v283_v53 }
  0x6e   :  { %541 = vmatprep.subr.mxu0 %v685_v0 }
  0x6f   :  { %542 = vmatpush3.msra.mxu0 %v282_v54 }
  0x70   :  { %543 = vmatprep.subr.mxu0 %v685_v0 }
  0x71   :  { %544 = vmatpush3.msra.mxu0 %v281_v55 }
  0x72   :  { %545 = vmatprep.subr.mxu0 %v685_v0 }
  0x73   :  { %546 = vmatpush3.msra.mxu0 %v280_v56 }
  0x74   :  { %547 = vmatprep.subr.mxu0 %v685_v0 }
  0x75   :  { %548 = vmatpush3.msra.mxu0 %v279_v57 }
 0x115   :  { %v170_v35 = vpop.f32.mrf.mxu0 }
 0x116   :  { %v171_v36 = vadd.f32 %v391_v34, %v170_v35 }
 0x117   :  { %v481_v37 = vpop.f32.mrf.mxu0 }
 0x118   :  { %v392_v38 = vmul.f32 -1.442695, %v171_v36 }
 0x11a   :  { %561 = vpow2.f32 %v392_v38 }
 0x127   :  { %v562_v39 = vpop.eup %561 }
 0x128   :  { %v177_v40 = vadd.f32 1.0, %v562_v39 }
 0x12a   :  { %563 = vrcp.f32 %v177_v40 }
 0x137   :  { %v564_v41 = vpop.eup %563 }
 0x138   :  { %515 = vmatmul.mubr.f32.vlgmr.msra.gmra.mxu1 %v564_v41 }
 0x1f8   :  { %v269_v59 = vpop.f32.mrf.mxu1 }
 0x1f9   :  { %v270_v60 = vadd.f32 %v393_v58, %v269_v59 }
 0x1fa   :  { %v516_v61 = vpop.f32.mrf.mxu1 }
 0x1fb   :  { %v394_v62 = vmul.f32 -1.442695, %v270_v60 }
 0x1fd   :  { %565 = vpow2.f32 %v394_v62 }
 0x20a   :  { %v566_v63 = vpop.eup %565 }
 0x20b   :  { %v276_v1 = vadd.f32 1.0, %v566_v63 }
 0x20d   :  { %567 = vrcp.f32 %v276_v1 }
 0x21a   :  { %v568_v2 = vpop.eup %567 }
 0x21b   :  { %550 = vmatmul.mubr.f32.vlgmr.msra.gmra.mxu0 %v568_v2 }
 0x2db   :  { %v368_v0 = vpop.f32.mrf.mxu0 }
 0x2dc   :  { %v369_v4 = vadd.f32 %v395_v3, %v368_v0 }
 0x2dd   :  { %v551_v5 = vpop.f32.mrf.mxu0 }
 0x2de   :  { %569 = vtanh.f32 %v369_v4 }
 0x2eb   :  { %v570_v6 = vpop.eup %569 }
 0x2ec   :  { %373 = vst [vmem:[#allocation10] sm:$0xff] %v570_v6 }
 0x2ed   :  { %662 = shalt.err (!%p659_p10)
}
 0x2ee   :  { %383 = dma.vmem_to_hbm [thread:$0]  %s381_s4, 128, %s822_s7, [#allocation4]  }
 0x2ef   :  { %677 = dma.done.wait [#allocation4], 128  }
 0x2f0   :  { %678 = vsyncadd [#allocation4], 4294967168 }
 0x2f1   :  { %387 = vsyncpa [#allocation3], 1 }
 0x2f2   :  { %388 = vsyncpa [#allocation6], 1 }
 0x2f3   :  { %389 = vsyncpa [#allocation9], 1 }
 0x2f4   :  { %390 = vsyncpa [#allocation4], 1 }

</bundles_post_ra>
